<compile_context>
chip_gen: v6e
topology: v6e:2x2x1
jax: 0.10.0
libtpu: 0.0.40
codegen_flags: <defaults>
</compile_context>

<pallas_src>
import jax
import jax.numpy as jnp
from jax import lax
from jax.experimental import pallas as pl
from jax.experimental.pallas import tpu as pltpu

LAYER_NORM_EPS = 1e-12
NEG_INF = 1e30  # float32 branch of the PyTorch module
# NOTE: p_mask polarity follows the provided module spec exactly:
#   logits = logits * p_mask - 1e30 * (1 - p_mask)   (p_mask == 1 -> keep)


def _pooler_end_logits_kernel(h_ref, sb_ref, w0a_ref, w1p_ref, pmask_ref,
                              b1_ref, out_ref):
    # h_ref:     (1, TS, H) bf16   hidden_states tile for this (batch, s-tile)
    # sb_ref:    (1, Sb, H) f32    precomputed start @ w0b + b0 (Sb = 1 or TS)
    # w0a_ref:   (H, H)     bf16   dense_0 weight slice acting on hidden_states
    # w1p_ref:   (1, H)     f32    gamma * w1  (LayerNorm affine folded in)
    # pmask_ref: (1, 1, TS) f32
    # b1_ref:    (1,)       f32    beta.w1 + b1, scalar in SMEM
    # out_ref:   (1, 1, TS) f32
    h = h_ref[0]                                                  # [TS, H] bf16

    # dense_0 on the hidden half: MXU matmul in bf16, f32 accumulation.
    x = jnp.dot(h, w0a_ref[...], preferred_element_type=jnp.float32)  # [TS, H]
    # add precomputed start-state projection + dense_0 bias (broadcast if Sb=1)
    x = x + sb_ref[0]

    # tanh activation (EUP, f32)
    x = jnp.tanh(x)

    # LayerNorm over hidden dim, single-pass statistics
    mean = jnp.mean(x, axis=-1, keepdims=True)
    msq = jnp.mean(x * x, axis=-1, keepdims=True)
    var = jnp.maximum(msq - mean * mean, 0.0)
    xn = (x - mean) * lax.rsqrt(var + LAYER_NORM_EPS)

    # dense_1 with folded LayerNorm affine:
    #   (xn*gamma + beta) . w1 + b1 == xn . (gamma*w1) + (beta.w1 + b1)
    logits = jnp.sum(xn * w1p_ref[...], axis=-1) + b1_ref[0]      # [TS]

    # p_mask (spec semantics: p_mask == 1 keeps the position)
    pm = pmask_ref[0, 0]                                          # [TS]
    out_ref[0, 0, :] = logits * pm - NEG_INF * (1.0 - pm)


def _choose_seq_tile(S):
    """Sequence tile: multiple of 128 (lane-dense stores) dividing S, else S."""
    if S <= 512:
        return S
    for ts in (512, 384, 256, 128):
        if S % ts == 0:
            return ts
    return S


def pooler_end_logits(hidden_states, params, start_positions=None,
                      start_states=None, p_mask=None):
    """JAX/Pallas equivalent of PoolerEndLogits.forward.

    hidden_states:   [B, S, H]
    start_positions: [B] int32 (optional)
    start_states:    [B, S, H] (optional; used per-position, as in the module)
    p_mask:          [B, S] (optional)
    returns logits:  [B, S] float32
    """
    assert start_states is not None or start_positions is not None
    B, S, H = hidden_states.shape
    f32 = jnp.float32

    w0 = params["w0"].astype(f32)       # [2H, H]  (x @ w0 + b0 convention)
    b0 = params["b0"].astype(f32)       # [H]
    gamma = params["gamma"].astype(f32)  # [H]
    beta = params["beta"].astype(f32)    # [H]
    w1 = params["w1"].astype(f32).reshape(H)   # [H]
    b1 = params["b1"].astype(f32).reshape(())  # scalar

    w0a = w0[:H, :]   # acts on hidden_states (stays in the kernel)
    w0b = w0[H:, :]   # acts on start_states  (precomputed in the wrapper)

    # --- start-state projection, precomputed outside the kernel -------------
    if start_positions is not None:
        start = hidden_states[jnp.arange(B), start_positions, :].astype(f32)
        start = start[:, None, :]                       # [B, 1, H]
    else:
        start = start_states.astype(f32)                # [B, S, H] general case
    start_bias = jnp.einsum("bsh,hk->bsk", start, w0b) + b0   # [B, Sb, H] f32
    Sb = start_bias.shape[1]

    # --- fold LayerNorm affine into dense_1 ----------------------------------
    w1p = (gamma * w1).reshape(1, H)                    # [1, H]
    b1p = (jnp.dot(beta, w1) + b1).reshape(1)           # [1] scalar (SMEM)

    if p_mask is None:
        p_mask = jnp.ones((B, S), dtype=f32)
    pmask3 = p_mask.reshape(B, 1, S).astype(f32)

    # --- bf16 operands for the MXU matmul (f32 accumulation in-kernel) ------
    h_bf16 = hidden_states.astype(jnp.bfloat16)
    w0a_bf16 = w0a.astype(jnp.bfloat16)

    TS = _choose_seq_tile(S)
    grid = (B, S // TS)

    if Sb == 1:
        sb_block = (1, 1, H)
        sb_map = lambda b, s: (b, 0, 0)
    else:
        sb_block = (1, TS, H)
        sb_map = lambda b, s: (b, s, 0)

    out = pl.pallas_call(
        _pooler_end_logits_kernel,
        out_shape=jax.ShapeDtypeStruct((B, 1, S), f32),
        grid_spec=pltpu.PrefetchScalarGridSpec(
            num_scalar_prefetch=0,
            grid=grid,
            in_specs=[
                pl.BlockSpec((1, TS, H), lambda b, s: (b, s, 0)),   # hidden bf16
                pl.BlockSpec(sb_block, sb_map),                     # start_bias
                pl.BlockSpec((H, H), lambda b, s: (0, 0)),          # w0a bf16
                pl.BlockSpec((1, H), lambda b, s: (0, 0)),          # gamma*w1
                pl.BlockSpec((1, 1, TS), lambda b, s: (b, 0, s)),   # p_mask
                pl.BlockSpec(memory_space=pltpu.MemorySpace.SMEM),  # b1' scalar
            ],
            out_specs=pl.BlockSpec((1, 1, TS), lambda b, s: (b, 0, s)),
        ),
        compiler_params=pltpu.CompilerParams(
            dimension_semantics=("parallel", "parallel"),
            vmem_limit_bytes=64 * 1024 * 1024,
        ),
    )(h_bf16, start_bias, w0a_bf16, w1p, pmask3, b1p)

    return out.reshape(B, S)


def _reference(hidden_states, params, start_positions, p_mask):
    """Pure-JAX f32 reference mirroring the PyTorch forward."""
    B, S, H = hidden_states.shape
    start = hidden_states[jnp.arange(B), start_positions, :][:, None, :]
    start = jnp.broadcast_to(start, (B, S, H))
    x = jnp.concatenate([hidden_states, start], axis=-1)
    x = x @ params["w0"] + params["b0"]
    x = jnp.tanh(x)
    mean = jnp.mean(x, axis=-1, keepdims=True)
    var = jnp.mean((x - mean) ** 2, axis=-1, keepdims=True)
    x = (x - mean) / jnp.sqrt(var + LAYER_NORM_EPS)
    x = x * params["gamma"] + params["beta"]
    x = (x @ params["w1"].reshape(H, 1) + params["b1"]).squeeze(-1)
    x = x * p_mask - NEG_INF * (1.0 - p_mask)
    return x


if __name__ == "__main__":
    B, S, H = 2, 8, 32  # batch, seq, hidden_size

    key = jax.random.PRNGKey(0)
    (k_h, k_w0, k_b0, k_g, k_be, k_w1, k_b1, k_pos, k_mask) = jax.random.split(key, 9)

    hidden_states = jax.random.normal(k_h, (B, S, H), dtype=jnp.float32)
    start_positions = jax.random.randint(k_pos, (B,), 0, S, dtype=jnp.int32)
    p_mask = (jax.random.uniform(k_mask, (B, S)) > 0.2).astype(jnp.float32)

    params = {
        # dense_0: Linear(2H -> H); stored as [2H, H] (x @ w0 + b0)
        "w0": jax.random.normal(k_w0, (2 * H, H), dtype=jnp.float32) * 0.05,
        "b0": jax.random.normal(k_b0, (H,), dtype=jnp.float32) * 0.05,
        # LayerNorm(H) — non-trivial affine so the dense_1 fold is exercised
        "gamma": 1.0 + 0.1 * jax.random.normal(k_g, (H,), dtype=jnp.float32),
        "beta": 0.1 * jax.random.normal(k_be, (H,), dtype=jnp.float32),
        # dense_1: Linear(H -> 1)
        "w1": jax.random.normal(k_w1, (H,), dtype=jnp.float32) * 0.05,
        "b1": jax.random.normal(k_b1, (1,), dtype=jnp.float32) * 0.05,
    }

    out = pooler_end_logits(hidden_states, params,
                            start_positions=start_positions, p_mask=p_mask)
    out = jax.block_until_ready(out)

    ref = _reference(hidden_states, params, start_positions, p_mask)
    assert out.shape == (B, S)
    # Tolerance accounts for the bf16 MXU matmul vs. the f32 reference.
    assert jnp.allclose(out, ref, rtol=2e-2, atol=2e-2), "mismatch vs reference"

    print("KERNEL_OK")
</pallas_src>

<mosaic_0001>
module attributes {stable_mosaic.version = 11 : i64} {
  func.func @_pooler_end_logits_kernel(%arg0: i32, %arg1: i32, %arg2: memref<1x8x32xbf16, #tpu.memory_space<vmem>>, %arg3: memref<1x1x32xf32, #tpu.memory_space<vmem>>, %arg4: memref<32x32xbf16, #tpu.memory_space<vmem>>, %arg5: memref<1x32xf32, #tpu.memory_space<vmem>>, %arg6: memref<1x1x8xf32, #tpu.memory_space<vmem>>, %arg7: memref<1xf32, #tpu.memory_space<smem>>, %arg8: memref<1x1x8xf32, #tpu.memory_space<vmem>>) attributes {dimension_semantics = [#tpu.dimension_semantics<parallel>, #tpu.dimension_semantics<parallel>], iteration_bounds = array<i64: 2, 1>, scalar_prefetch = 0 : i64, scratch_operands = 0 : i64, tpu.core_type = #tpu.core_type<tc>, window_params = [{transform_indices = @transform_0, window_bounds = array<i64: 1, 8, 32>}, {transform_indices = @transform_1, window_bounds = array<i64: 1, 1, 32>}, {pipeline_mode = #tpu.pipeline_mode<synchronous>, transform_indices = @transform_2, window_bounds = array<i64: 32, 32>}, {pipeline_mode = #tpu.pipeline_mode<synchronous>, transform_indices = @transform_3, window_bounds = array<i64: 1, 32>}, {transform_indices = @transform_4, window_bounds = array<i64: 1, 1, 8>}, {transform_indices = @transform_5, window_bounds = array<i64: 1>}, {transform_indices = @transform_6, window_bounds = array<i64: 1, 1, 8>}]} {
    %c0 = arith.constant 0 : index
    %c0_0 = arith.constant 0 : index
    %c0_1 = arith.constant 0 : index
    %0 = vector.load %arg2[%c0, %c0_0, %c0_1] : memref<1x8x32xbf16, #tpu.memory_space<vmem>>, vector<1x8x32xbf16>
    %1 = vector.shape_cast %0 : vector<1x8x32xbf16> to vector<8x32xbf16>
    %c0_2 = arith.constant 0 : index
    %c0_3 = arith.constant 0 : index
    %2 = vector.load %arg4[%c0_2, %c0_3] : memref<32x32xbf16, #tpu.memory_space<vmem>>, vector<32x32xbf16>
    %cst = arith.constant dense<0.000000e+00> : vector<8x32xf32>
    %3 = tpu.matmul %1, %2, %cst {dimension_numbers = #tpu.dot_dimension_numbers<[1], [0], [0], [1], [0, 0, 1, 1], [], []>} : vector<8x32xbf16>, vector<32x32xbf16>, vector<8x32xf32> -> vector<8x32xf32>
    %c0_4 = arith.constant 0 : index
    %c0_5 = arith.constant 0 : index
    %c0_6 = arith.constant 0 : index
    %4 = vector.load %arg3[%c0_4, %c0_5, %c0_6] : memref<1x1x32xf32, #tpu.memory_space<vmem>>, vector<1x1x32xf32>
    %5 = vector.shape_cast %4 : vector<1x1x32xf32> to vector<1x32xf32>
    %6 = vector.broadcast %5 : vector<1x32xf32> to vector<8x32xf32>
    %7 = arith.addf %3, %6 : vector<8x32xf32>
    %8 = math.tanh %7 : vector<8x32xf32>
    %cst_7 = arith.constant dense<0.000000e+00> : vector<8xf32>
    %9 = vector.multi_reduction <add>, %8, %cst_7 [1] : vector<8x32xf32> to vector<8xf32>
    %10 = vector.shape_cast %9 : vector<8xf32> to vector<8x1xf32>
    %cst_8 = arith.constant 3.200000e+01 : f32
    %11 = vector.broadcast %cst_8 : f32 to vector<8x1xf32>
    %12 = arith.divf %10, %11 : vector<8x1xf32>
    %13 = arith.mulf %8, %8 : vector<8x32xf32>
    %cst_9 = arith.constant dense<0.000000e+00> : vector<8xf32>
    %14 = vector.multi_reduction <add>, %13, %cst_9 [1] : vector<8x32xf32> to vector<8xf32>
    %15 = vector.shape_cast %14 : vector<8xf32> to vector<8x1xf32>
    %cst_10 = arith.constant 3.200000e+01 : f32
    %16 = vector.broadcast %cst_10 : f32 to vector<8x1xf32>
    %17 = arith.divf %15, %16 : vector<8x1xf32>
    %18 = arith.mulf %12, %12 : vector<8x1xf32>
    %19 = arith.subf %17, %18 : vector<8x1xf32>
    %cst_11 = arith.constant 0.000000e+00 : f32
    %20 = vector.broadcast %cst_11 : f32 to vector<8x1xf32>
    %21 = arith.maximumf %19, %20 : vector<8x1xf32>
    %22 = vector.broadcast %12 : vector<8x1xf32> to vector<8x32xf32>
    %23 = arith.subf %8, %22 : vector<8x32xf32>
    %cst_12 = arith.constant 9.99999996E-13 : f32
    %24 = vector.broadcast %cst_12 : f32 to vector<8x1xf32>
    %25 = arith.addf %21, %24 : vector<8x1xf32>
    %26 = math.rsqrt %25 : vector<8x1xf32>
    %27 = vector.broadcast %26 : vector<8x1xf32> to vector<8x32xf32>
    %28 = arith.mulf %23, %27 : vector<8x32xf32>
    %c0_13 = arith.constant 0 : index
    %c0_14 = arith.constant 0 : index
    %29 = vector.load %arg5[%c0_13, %c0_14] : memref<1x32xf32, #tpu.memory_space<vmem>>, vector<1x32xf32>
    %30 = vector.broadcast %29 : vector<1x32xf32> to vector<8x32xf32>
    %31 = arith.mulf %28, %30 : vector<8x32xf32>
    %cst_15 = arith.constant dense<0.000000e+00> : vector<8xf32>
    %32 = vector.multi_reduction <add>, %31, %cst_15 [1] : vector<8x32xf32> to vector<8xf32>
    %c0_16 = arith.constant 0 : index
    %33 = memref.load %arg7[%c0_16] : memref<1xf32, #tpu.memory_space<smem>>
    %34 = vector.broadcast %33 : f32 to vector<8xf32>
    %35 = arith.addf %32, %34 : vector<8xf32>
    %c0_17 = arith.constant 0 : index
    %c0_18 = arith.constant 0 : index
    %c0_19 = arith.constant 0 : index
    %36 = vector.load %arg6[%c0_17, %c0_18, %c0_19] : memref<1x1x8xf32, #tpu.memory_space<vmem>>, vector<1x1x8xf32>
    %37 = vector.shape_cast %36 : vector<1x1x8xf32> to vector<8xf32>
    %38 = arith.mulf %35, %37 : vector<8xf32>
    %cst_20 = arith.constant 1.000000e+00 : f32
    %39 = vector.broadcast %cst_20 : f32 to vector<8xf32>
    %40 = arith.subf %39, %37 : vector<8xf32>
    %cst_21 = arith.constant 1.000000e+30 : f32
    %41 = vector.broadcast %cst_21 : f32 to vector<8xf32>
    %42 = arith.mulf %41, %40 : vector<8xf32>
    %43 = arith.subf %38, %42 : vector<8xf32>
    %c0_22 = arith.constant 0 : index
    %c0_23 = arith.constant 0 : index
    %c0_24 = arith.constant 0 : index
    %44 = vector.load %arg8[%c0_22, %c0_23, %c0_24] : memref<1x1x8xf32, #tpu.memory_space<vmem>>, vector<1x1x8xf32>
    %45 = vector.shape_cast %44 : vector<1x1x8xf32> to vector<8xf32>
    %46 = vector.shape_cast %43 : vector<8xf32> to vector<1x1x8xf32>
    tpu.vector_store %arg8[%c0_22, %c0_23, %c0_24], %46 {strides = array<i32>} : memref<1x1x8xf32, #tpu.memory_space<vmem>>, vector<1x1x8xf32>,
    return
  }
  func.func @transform_0(%arg0: i32, %arg1: i32) -> (i32, i32, i32) {
    %c0_i32 = arith.constant 0 : i32
    %c0_i32_0 = arith.constant 0 : i32
    return %arg0, %arg1, %c0_i32 : i32, i32, i32
  }
  func.func @transform_1(%arg0: i32, %arg1: i32) -> (i32, i32, i32) {
    %c0_i32 = arith.constant 0 : i32
    %c0_i32_0 = arith.constant 0 : i32
    %c0_i32_1 = arith.constant 0 : i32
    return %arg0, %c0_i32, %c0_i32_0 : i32, i32, i32
  }
  func.func @transform_2(%arg0: i32, %arg1: i32) -> (i32, i32) {
    %c0_i32 = arith.constant 0 : i32
    %c0_i32_0 = arith.constant 0 : i32
    %c0_i32_1 = arith.constant 0 : i32
    return %c0_i32, %c0_i32_0 : i32, i32
  }
  func.func @transform_3(%arg0: i32, %arg1: i32) -> (i32, i32) {
    %c0_i32 = arith.constant 0 : i32
    %c0_i32_0 = arith.constant 0 : i32
    %c0_i32_1 = arith.constant 0 : i32
    return %c0_i32, %c0_i32_0 : i32, i32
  }
  func.func @transform_4(%arg0: i32, %arg1: i32) -> (i32, i32, i32) {
    %c0_i32 = arith.constant 0 : i32
    %c0_i32_0 = arith.constant 0 : i32
    return %arg0, %c0_i32, %arg1 : i32, i32, i32
  }
  func.func @transform_5(%arg0: i32, %arg1: i32) -> i32 {
    %c0_i32 = arith.constant 0 : i32
    %c0_i32_0 = arith.constant 0 : i32
    return %c0_i32 : i32
  }
  func.func @transform_6(%arg0: i32, %arg1: i32) -> (i32, i32, i32) {
    %c0_i32 = arith.constant 0 : i32
    %c0_i32_0 = arith.constant 0 : i32
    return %arg0, %c0_i32, %arg1 : i32, i32, i32
  }
}

</mosaic_0001>

<bundles_post_ra>
// kernel: tpu_custom_call.1
= control target key start
LH: loop header
LB: loop body
LE: loop exit
PB: predicated region body
PF: predicated region fallthrough
CT: control target
= control target key end

     0   :  { %s1080_s0 = inlined_call_operand.hbm [shape: bf16[2,8,32], index: 0, kind: input, shape index: {}]   ;;  %s1081_s1 = inlined_call_operand.vmem [shape: f32[2,1,32], index: 1, kind: input, shape index: {}]   ;;  %s1082_s2 = inlined_call_operand.hbm [shape: bf16[32,32], index: 2, kind: input, shape index: {}]   ;;  %s1083_s3 = inlined_call_operand.vmem [shape: f32[1,32], index: 3, kind: input, shape index: {}]   ;;  %s1084_s4 = inlined_call_operand.vmem [shape: f32[2,1,8], index: 4, kind: input, shape index: {}]   ;;  %s1085_s5 = inlined_call_operand.<no memory space> [shape: f32[1], index: 5, kind: input, shape index: {}]   ;;  %s1086_s6 = inlined_call_operand.hbm [shape: f32[2,1,8], index: 6, kind: output, shape index: {}]  }
   0x1   :  { %1089 = sst [smem:[#allocation13_spill]] %s1082_s2 }
   0x2   :  { %11 = sst [smem:[#allocation2]] %s1085_s5 }
   0x3   :  { %12 = vsyncpa [#allocation4], 0 }
   0x4   :  { %14 = vsyncpa [#allocation4 + $0x1], 0 }
   0x5   :  { %15 = vsyncpa [#allocation7], 0 }
   0x6   :  { %16 = vsyncpa [#allocation5], 0 }
   0x7   :  { %18 = vsyncpa [#allocation5 + $0x1], 0  ;;  %s897_s23 = smov 0   ;;  %s899_s24 = smov 0  }
   0x8   :  { %s901_s25 = smov 0   ;;  %s903_s26 = smov 0  }
   0x9   :  { %s905_s27 = smov 0   ;;  %s907_s28 = smov 0  }
   0xa LB: > { %s596_s5 = sadd.s32 4294967295, %s849_s28   ;;  %s597_s29 = sadd.s32 4294967294, %s849_s28   ;;  %s849_s28 = sphi %s907_s28, %s24_s28   ;;  %s845_s27 = sphi %s905_s27, %s1109_s27   ;;  %s841_s26 = sphi %s903_s26, %s1108_s26   ;;  %s837_s25 = sphi %s901_s25, %s1107_s25   ;;  %s833_s24 = sphi %s899_s24, %s1106_s24   ;;  %s829_s23 = sphi %s897_s23, %s1105_s23  }
   0xb   : > { %p58_p0 = scmp.ne.s32.totalorder %s833_s24, %s829_s23  ;;  %p931_p1 = scmp.eq.s32.totalorder %s596_s5, 0 }
   0xc   : > { %p935_p2 = scmp.eq.s32.totalorder %s596_s5, 1  ;;  %p207_p3 = scmp.eq.s32.totalorder %s597_s29, 1 }
   0xd   : > { %p941_p4 = por %p931_p1, %p58_p0  ;;  %p598_p5 = scmp.ge.s32.totalorder %s849_s28, 1 }
   0xe   : > { %p946_p6 = por %p207_p3, %p58_p0  ;;  %p214_p7 = scmp.lt.s32.totalorder %s849_s28, 3 }
   0xf   : > { %s1092_s8 = scalar_select %p941_p4, 1, 0 }
  0x10   : > { %s1093_s9 = scalar_select %p946_p6, 1, 0 }
  0x11   : > { %p951_p8 = pnand %p598_p5, %p214_p7  ;;  %s851_s11 = smov [#allocation6]  }
  0x12   : > { %s226_s12 = sshll.u32 %s851_s11, 4  ;;  %s36_s14 = sadd.s32 1, %s845_s27  ;;  %s227_s12 = int_to_ptr.vmem [resolvable:$true] %s226_s12 }
  0x13   : > { %p633_p9 = pneg %p951_p8  ;;  %s722_s15 = scalar_lea.vmem %s227_s12, 256 }
  0x14   : > { %p723_p13 = scmp.ne.s32.totalorder %s227_s12, %s722_s15  ;;  %p730_p5 = scmp.lt.s32.totalorder %s227_s12, %s227_s12 }
  0x15   : > { %p960_p11 = pnand %p633_p9, %p931_p1  ;;  %p731_p7 = scmp.lt.s32.totalorder %s722_s15, %s722_s15 }
  0x17   : > { %p713_p12 = pneg %p960_p11  ;;  %p732_p6 = por %p731_p7, %p730_p5 }
  0x19   : > { %p725_p0 = pnand %p723_p13, %p713_p12 }
  0x1b   : > { %p726_p3 = pneg %p725_p0 }
  0x1d   : > { %p733_p4 = pnand %p732_p6, %p726_p3 }
  0x1f   : > { %736 = shalt.err (!%p733_p4)
}
  0x20   : > { %s852_s16 = smov 64   ;;  %s853_s17 = smov 4  }
  0x21   : > { %s1096_s2 = sld [smem:[#allocation13_spill]]  ;;  %p38_p6 = scmp.ge.s32.totalorder %s36_s14, 2 }
  0x22   : > { %s45_s20 = sadd.s32 1, %s837_s25  ;;  %p52_p4 = scmp.ne.s32.totalorder %s837_s25, %s833_s24 }
  0x23   : > { %p53_p9 = scmp.eq.s32.totalorder %s849_s28, 0  ;;  %s1111_s14 = smov (%p38_p6, %s36_s14), 0 }
  0x24   : > { %1097 = sst [smem:[#allocation12_spill]] %s1111_s14  ;;  %p984_p13 = por %p935_p2, %p52_p4 }
  0x25   : > { %p978_p12 = por %p53_p9, %p52_p4  ;;  %s40_s5 = ssub.s32 %s845_s27, %s1111_s14 }
  0x26   : > { %p646_p0 = scmp.lt.s32.totalorder %s849_s28, 2  ;;  %s246_s29 = sand.u32 1, %s837_s25  }
  0x27   : > { %636 = dma.hbm_to_vmem [thread:$0]  (!%p960_p11), %s1096_s2, 256, %s227_s12, [#allocation7], %s852_s16, %s852_s16, %s853_s17  }
  0x28   : > { %p43_p11 = scmp.eq.s32.totalorder %s40_s5, 0  ;;  %s601_s11 = sshll.u32 %s246_s29, 2 }
  0x29   : > { %s602_s13 = sshll.u32 %s845_s27, 6  ;;  %s250_s18 = scalar_lea.vmem [#allocation3], %s601_s11 }
  0x2a   : > { %s993_s12 = scalar_select %p43_p11, %s837_s25, %s45_s20  }
  0x2b   : > { %s256_s17 = scalar_lea.hbm %s1080_s0, %s602_s13  ;;  %s258_s19 = sshll.u32 %s250_s18, 4  ;;  %s259_s19 = int_to_ptr.vmem [resolvable:$true] %s258_s19 }
  0x2c   : > { %p1001_p2 = pnand %p646_p0, %p978_p12  ;;  %s247_s2 = scalar_lea.sflag [#allocation4], %s246_s29 }
  0x2d   : > { %s750_s5 = scalar_lea.vmem %s259_s19, 64  ;;  %s854_s20 = smov [#allocation3]  }
  0x2e   : > { %p739_p3 = pneg %p1001_p2  ;;  %p751_p5 = scmp.ne.s32.totalorder %s259_s19, %s750_s5 }
  0x2f   : > { %s755_s14 = sshll.u32 %s854_s20, 4  ;;  %s756_s14 = int_to_ptr.vmem [resolvable:$false] %s755_s14 }
  0x30   : > { %p753_p7 = pnand %p751_p5, %p739_p3  ;;  %s757_s13 = scalar_lea.vmem %s756_s14, 128 }
  0x31   : > { %p758_p4 = scmp.lt.s32.totalorder %s259_s19, %s756_s14  ;;  %p759_p9 = scmp.lt.s32.totalorder %s757_s13, %s750_s5 }
  0x32   : > { %p754_p6 = pneg %p753_p7 }
  0x33   : > { %p760_p11 = por %p759_p9, %p758_p4 }
  0x35   : > { %p761_p10 = pnand %p760_p11, %p754_p6 }
  0x37   : > { %764 = shalt.err (!%p761_p10)
}
  0x38   : > { %640 = dma.hbm_to_vmem [thread:$0]  (!%p1001_p2), %s256_s17, 64, %s259_s19, %s247_s2  }
  0x39   : > { %282 = sbr.rel (%p951_p8) target bundleno = 738 (0x2e2), region = 44  ;;  %s1012_s21 = sand.u32 (!%p951_p8), 1, %s833_s24  }
  0x3a   : > { %s604_s29 = sshll.u32 (!%p951_p8), %s1012_s21, 2  ;;  %s285_s11 = scalar_lea.sflag (!%p951_p8), [#allocation4], %s1012_s21 }
  0x3b   : > { %s288_s15 = scalar_lea.vmem (!%p951_p8), [#allocation3], %s604_s29  ;;  %p1101_p12 = scmp.ne.s32.totalorder (!%p951_p8), %s1092_s8, 0 }
  0x3e   : > { %816 = dma.done.wait (%p1101_p12), %s285_s11, 64  }
  0x3f   : > { %818 = vsyncadd (%p1101_p12), %s285_s11, 4294967232 }
  0x40   : > { %820 = dma.done.wait (%p931_p1), [#allocation7], 256  }
  0x41   : > { %822 = vsyncadd (%p931_p1), [#allocation7], 4294967040  ;;  %v855_v0 = vmov 0.0   ;;  %vm856_vm0 = vmmov 0   ;;  %v705_v1 = vld [vmem:[#allocation6 + $0x8] sm:$0xff]   ;;  %v706_v2 = vld [vmem:[#allocation6] sm:$0xff]   ;;  %v441_v14 = vlaneseq }
  0x42   : > { %617 = vmatprep.subr.bf16.mxu0 %v855_v0  ;;  %621 = vmatprep.mubr.msk.bf16.mxu0 %vm856_vm0, %v855_v0  ;;  %v339_v3 = vld [vmem:[%s288_s15] sm:$0xf]  ;;  %vm363_vm1 = vcmask 261120   ;;  %p329_p8 = scmp.lt.s32.totalorder %s841_s26, 1  ;;  %v857_v36 = vmov 0   ;;  %s436_s7 = sld [smem:[#allocation2]] }
  0x43   : > { %618 = vmatpush3.bf16.msra.mxu0 %v705_v1  ;;  %v442_v15 = vshrl.u32 %v441_v14, 7  ;;  %v610_v32 = vld [vmem:[%s1083_s3] ss:$0 sm:$0xff]  ;;  %704 = vset.pattern.permute.xlu0 %v857_v36  ;;  %v467_v44 = vand.u32 127, %v441_v14  ;;  %s611_s5 = sshll.u32 %s841_s26, 4  ;;  %s328_s20 = scalar_lea.vmem [#allocation8], %s1012_s21 }
  0x44   : > { %619 = vmatprep.subr.bf16.mxu0 %v855_v0  ;;  %s330_s2 = scalar_select %p329_p8, %s841_s26, 1  ;;  %703 = vset.pattern.permute.xlu1 %v857_v36  ;;  %vm473_vm2 = vcmask 57344  }
  0x45   : > { %v443_v16 = vsub.s32 0, %v442_v15  ;;  %v470_v45 = vsub.s32 %v467_v44, %v442_v15  ;;  %s489_s13 = sshll.u32 %s328_s20, 4  ;;  %s487_s15 = scalar_lea.hbm %s1086_s6, %s611_s5  ;;  %s490_s13 = int_to_ptr.vmem [resolvable:$true] %s489_s13 }
  0x46   : > { %s331_s10 = scalar_lea.vmem %s1081_s1, %s330_s2  ;;  %s337_s17 = scalar_lea.vmem %s1084_s4, %s330_s2 }
  0x47   : > { %620 = vmatpush3.bf16.msra.mxu0 %v706_v2  ;;  %v606_v4 = vld [vmem:[%s331_s10] ss:$0 sm:$0xff]  ;;  %s476_s2 = scalar_lea.sflag [#allocation5], %s1012_s21  ;;  %s765_s8 = scalar_lea.vmem %s490_s13, 16 }
  0x48   : > { %v439_v17 = vld [vmem:[%s337_s17] sm:$0x1]  ;;  %v437_v37 = vstv %s436_s7  ;;  %p766_p1 = scmp.ne.s32.totalorder %s490_s13, %s765_s8  ;;  %s858_s30 = smov [#allocation8]  }
  0x49   : > { %v444_v18 = vrot.slane %v439_v17, %v443_v16  ;;  %v450_v19 = vsub.f32 1.0, %v439_v17  ;;  %s769_s10 = sshll.u32 %s858_s30, 4  ;;  %s770_s10 = int_to_ptr.vmem [resolvable:$false] %s769_s10 }
  0x4a   : > { %622 = vmatmul.mubr.msk.bf16.vlgmr.msra.gmra.mxu0 %vm363_vm1, %v339_v3  ;;  %p767_p10 = pnand %p766_p1, %p984_p13  ;;  %s771_s26 = scalar_lea.vmem %s770_s10, 32 }
  0x4b   : > { %v451_v20 = vmul.f32 1e+30, %v450_v19  ;;  %p772_p2 = scmp.lt.s32.totalorder %s490_s13, %s770_s10  ;;  %p773_p3 = scmp.lt.s32.totalorder %s771_s26, %s765_s8 }
  0x4c   : > { %p768_p0 = pneg %p767_p10 }
  0x4d   : > { %v456_v21 = vrot.slane %v451_v20, %v443_v16  ;;  %p774_p5 = por %p773_p3, %p772_p2 }
  0x4f   : > { %p775_p7 = pnand %p774_p5, %p768_p0 }
 0x10a   : > { %v401_v5 = vpop.f32.mrf.mxu0 }
 0x10b   : > { %v402_v6 = vadd.f32 %v606_v4, %v401_v5 }
 0x10c   : > { %v623_v7 = vpop.f32.mrf.mxu0 }
 0x10d   : > { %707 = vtanh.f32 %v402_v6 }
 0x10e   : > { %v404_v8 = vpop.f32.mrf.mxu0 }
 0x110   : > { %v624_v9 = vpop.f32.mrf.mxu0 }
 0x11a   : > { %v708_v10 = vpop.eup %707 }
 0x11b   : > { %v408_v11 = vsel %vm363_vm1, %v708_v10, 0.0  ;;  %v413_v12 = vmul.f32 %v708_v10, %v708_v10 }
 0x11c   : > { %409 = vadd.xlane.f32.xlu0 %v408_v11 }
 0x11d   : > { %v414_v13 = vsel %vm363_vm1, %v413_v12, 0.0 }
 0x120   : > { %415 = vadd.xlane.f32.xlu0 %v414_v13 }
 0x136   : > { %458 = vbcast.lane.b32.xlu0 %v456_v21, 256 }
 0x1a5   : > { %v410_v22 = vpop.xlane.xlu0 %409 }
 0x1a6   : > { %v412_v23 = vmul.f32 0.03125, %v410_v22 }
 0x1a8   : > { %v418_v25 = vmul.f32 %v412_v23, %v412_v23  ;;  %v421_v30 = vsub.f32 %v708_v10, %v412_v23 }
 0x1a9   : > { %v416_v24 = vpop.xlane.xlu0 %415 }
 0x1aa   : > { %v417_v26 = vmul.f32 0.03125, %v416_v24 }
 0x1ac   : > { %v419_v27 = vsub.f32 %v417_v26, %v418_v25 }
 0x1ad   : > { %v459_v41 = vpop.permute.xlu0 %458 }
 0x1ae   : > { %v420_v28 = vmax.f32 %v419_v27, 0.0 }
 0x1b0   : > { %v422_v29 = vadd.f32 1e-12, %v420_v28 }
 0x1b2   : > { %709 = vrsqrt.f32 %v422_v29 }
 0x1bf   : > { %v710_v31 = vpop.eup %709 }
 0x1c0   : > { %v424_v33 = vmul.f32 %v710_v31, %v421_v30 }
 0x1c2   : > { %v432_v34 = vmul.f32 %v610_v32, %v424_v33 }
 0x1c4   : > { %v433_v35 = vsel %vm363_vm1, %v432_v34, 0.0 }
 0x1c5   : > { %434 = vadd.xlane.f32.xlu1 %v433_v35 }
 0x1d6   : > { %446 = vbcast.lane.b32.xlu1 %v444_v18, 256 }
 0x24e   : > { %v435_v38 = vpop.xlane.xlu1 %434 }
 0x24f   : > { %v438_v39 = vadd.f32 %v437_v37, %v435_v38 }
 0x252   : > { %v447_v40 = vpop.permute.xlu1 %446 }
 0x253   : > { %v449_v42 = vmul.f32 %v447_v40, %v438_v39 }
 0x255   : > { %v461_v43 = vsub.f32 %v449_v42, %v459_v41 }
 0x257   : > { %464 = vperm.xlu1 %703, %v461_v43  }
 0x2d2   : > { %v465_v46 = vpop.permute.xlu1 %464 }
 0x2d3   : > { %v471_v47 = vrot.slane %v465_v46, %v470_v45 }
 0x2d5   : > { %474 = vst.msk [vmem:[%s328_s20] sm:$0x1] %vm473_vm2, %v471_v47 }
 0x2d6   : > { %778 = shalt.err (!%p775_p7)
}
 0x2d7   : > { %s779_s14 = scalar_lea.hbm %s487_s15, 16  ;;  %s783_s17 = scalar_lea.hbm %s1086_s6, 32 }
 0x2d8   : > { %p780_p6 = scmp.ne.s32.totalorder %s487_s15, %s779_s14  ;;  %p784_p11 = scmp.lt.s32.totalorder %s487_s15, %s1086_s6 }
 0x2d9   : > { %p785_p12 = scmp.lt.s32.totalorder %s783_s17, %s779_s14 }
 0x2da   : > { %p781_p4 = pnand %p780_p6, %p984_p13 }
 0x2db   : > { %p786_p8 = por %p785_p12, %p784_p11 }
 0x2dc   : > { %p782_p9 = pneg %p781_p4 }
 0x2de   : > { %p787_p1 = pnand %p786_p8, %p782_p9 }
 0x2e0   : > { %790 = shalt.err (!%p787_p1)
}
 0x2e1   : > { %631 = dma.vmem_to_hbm [thread:$0]  (%p984_p13), %s490_s13, 16, %s487_s15, %s476_s2  }
 0x2e2 PF: > { %s501_s7 = sand.u32 1, %s829_s23   ;;  %p1102_p10 = scmp.ne.s32.totalorder %s1093_s9, 0 }
 0x2e3   : > { %p1103_p0 = scmp.ge.s32.totalorder %s849_s28, 2  ;;  %s502_s5 = scalar_lea.sflag [#allocation5], %s501_s7 }
 0x2e5   : > { %p642_p2 = pnand %p1103_p0, %p1102_p10 }
 0x2e7   : > { %p643_p3 = pneg %p642_p2 }
 0x2e9   : > { %824 = dma.done.wait (%p643_p3), %s502_s5, 16  }
 0x2ea   : > { %826 = vsyncadd (%p643_p3), %s502_s5, 4294967280  ;;  %s24_s28 = sadd.s32 1, %s849_s28   ;;  %s1104_s22 = sld [smem:[#allocation12_spill]] }
 0x2eb   : > { %p21_p5 = scmp.ge.s32.totalorder %s24_s28, 4   ;;  %s1105_s23 = smov %s833_s24 }
 0x2ec   : > { %s1106_s24 = smov %s837_s25  ;;  %s1107_s25 = smov %s993_s12 }
 0x2ed   : > { %s1108_s26 = smov %s845_s27  ;;  %23 = sbr.rel (!%p21_p5) target bundleno = 10 (0xa), region = 99 }
 0x2f0   : > { %s1109_s27 = smov %s1104_s22 }
 0x2f2   :  { %506 = vsyncpa [#allocation4], 1 }
 0x2f3   :  { %508 = vsyncpa [#allocation4 + $0x1], 1 }
 0x2f4   :  { %509 = vsyncpa [#allocation7], 1 }
 0x2f5   :  { %510 = vsyncpa [#allocation5], 1 }
 0x2f6   :  { %512 = vsyncpa [#allocation5 + $0x1], 1 }

</bundles_post_ra>
